<compile_context>
chip_gen: v6e
topology: v6e:2x2x1
jax: 0.10.0
libtpu: 0.0.40
codegen_flags: <defaults>
</compile_context>

<pallas_src>
import functools

import jax
import jax.numpy as jnp
from jax.experimental import pallas as pl
from jax.experimental.pallas import tpu as pltpu


def _leaky_relu(x, slope):
    return jnp.where(x >= 0, x, slope * x)


def _mlp_kernel(x_ref, *refs, num_layers, lrelu_slope, matmul_dtype):
    """Fused feature-major MLP over one batch tile.

    x_ref   : (D, block_b)        input activations, batch on the lane dim
    refs    : (w0, b0, ..., w_{L-1}, b_{L-1}, out_ref)
              w_l : (out_l, in_l) PyTorch nn.Linear orientation
              b_l : (out_l, 1)    f32
    out_ref : (out_node, block_b)
    """
    out_ref = refs[-1]
    param_refs = refs[:-1]

    h = x_ref[...]                                   # (D, block_b) f32
    if matmul_dtype is not None:
        h = h.astype(matmul_dtype)                   # in-kernel cast (free under DMA slack)

    for l in range(num_layers):
        w = param_refs[2 * l][...]                   # (out_l, in_l)
        b = param_refs[2 * l + 1][...]               # (out_l, 1) f32
        acc = jnp.dot(w, h, preferred_element_type=jnp.float32)   # (out_l, block_b) f32
        acc = acc + b                                # lane-broadcast bias, f32 VPU
        if l < num_layers - 1:                       # LeakyReLU after all but last layer
            acc = _leaky_relu(acc, lrelu_slope)
            h = acc if matmul_dtype is None else acc.astype(matmul_dtype)
        else:
            h = acc
    out_ref[...] = h.astype(out_ref.dtype)


def vanilla_mlp_forward(x, weights, biases, lrelu_slope, block_b=1024,
                        matmul_dtype=None):
    """Forward pass of VanillaMLP.

    x          : (N, D) float32
    weights[l] : (out_l, in_l)  (PyTorch nn.Linear layout)
    biases[l]  : (out_l,)
    Returns (N, out_node) float32.
    """
    N, D = x.shape
    num_layers = len(weights)
    out_node = weights[-1].shape[0]
    assert block_b % 128 == 0, "block_b must be a multiple of 128 (lane width)"

    # Batch tile selection: large tile to amortize per-step overhead, but keep
    # at least two grid steps when the batch allows it (v7x: 2 TensorCores),
    # and never pad the batch by more than one tile.
    lanes = pl.cdiv(N, 128) * 128
    if lanes >= 256:
        block_b = min(block_b, max(128, (lanes // 2) // 128 * 128))
    else:
        block_b = 128
    n_pad = pl.cdiv(N, block_b) * block_b
    grid = (n_pad // block_b,)

    # Feature-major input (D, n_pad): one cheap fused transpose(+pad) over the
    # small input buys lane-dense loads/stores with zero feature padding.
    xt = x.T
    if n_pad != N:
        xt = jnp.pad(xt, ((0, 0), (0, n_pad - N)))

    params = []
    in_specs = [pl.BlockSpec((D, block_b), lambda i: (0, i))]
    for w, b in zip(weights, biases):
        w_c = w if matmul_dtype is None else w.astype(matmul_dtype)
        b2 = b.astype(jnp.float32).reshape(-1, 1)
        params += [w_c, b2]
        in_specs += [
            pl.BlockSpec(w_c.shape, lambda i: (0, 0)),   # resident in VMEM across grid
            pl.BlockSpec(b2.shape, lambda i: (0, 0)),
        ]

    kernel = functools.partial(
        _mlp_kernel,
        num_layers=num_layers,
        lrelu_slope=lrelu_slope,
        matmul_dtype=matmul_dtype,
    )

    # Advisory cost estimate (real sizes, no padded feature columns).
    flops = 2 * n_pad * sum(int(w.shape[0]) * int(w.shape[1]) for w in weights)
    bytes_accessed = (
        int(xt.size) * xt.dtype.itemsize
        + n_pad * out_node * 4
        + sum(int(p.size) * p.dtype.itemsize for p in params)
    )
    cost = pl.CostEstimate(flops=flops, transcendentals=0,
                           bytes_accessed=bytes_accessed)

    out = pl.pallas_call(
        kernel,
        out_shape=jax.ShapeDtypeStruct((out_node, n_pad), jnp.float32),
        grid=grid,
        in_specs=in_specs,
        out_specs=pl.BlockSpec((out_node, block_b), lambda i: (0, i)),
        compiler_params=pltpu.CompilerParams(dimension_semantics=("parallel",)),
        cost_estimate=cost,
    )(xt, *params)

    return out[:, :N].T                              # (N, out_node)


def init_vanilla_mlp_params(key, mlp, hidden, pos_level, depth_level, out_node):
    """Deterministic init matching nn.Linear defaults: U[-1/sqrt(fan_in), 1/sqrt(fan_in)].

    Weights returned in PyTorch (out, in) orientation."""
    in_dim = pos_level * 2 * 2 + depth_level * 2
    dims = [in_dim] + [hidden] * (mlp + 1) + [out_node]
    weights, biases = [], []
    for l in range(len(dims) - 1):
        fan_in, fan_out = dims[l], dims[l + 1]
        key, kw, kb = jax.random.split(key, 3)
        bound = 1.0 / (fan_in ** 0.5)
        w = jax.random.uniform(kw, (fan_out, fan_in), jnp.float32, -bound, bound)
        b = jax.random.uniform(kb, (fan_out,), jnp.float32, -bound, bound)
        weights.append(w)
        biases.append(b)
    return weights, biases


def _reference_forward(x, weights, biases, lrelu_slope):
    """Pure-JAX f32 reference (batch-major, like the PyTorch module)."""
    h = x
    for l, (w, b) in enumerate(zip(weights, biases)):
        h = jnp.dot(h, w.T, preferred_element_type=jnp.float32) + b
        if l < len(weights) - 1:
            h = jnp.where(h >= 0, h, lrelu_slope * h)
    return h


if __name__ == "__main__":
    # Module hyper-parameters (small, consistent with VanillaMLP.__init__)
    mlp = 2
    hidden = 32
    pos_level = 4
    depth_level = 4
    lrelu_slope = 0.1
    out_node = 4

    in_dim = pos_level * 2 * 2 + depth_level * 2   # = 24
    N = 16                                         # batch of input points

    key = jax.random.PRNGKey(0)
    key, kx = jax.random.split(key)
    x = jax.random.normal(kx, (N, in_dim), jnp.float32)

    weights, biases = init_vanilla_mlp_params(
        key, mlp, hidden, pos_level, depth_level, out_node
    )

    out = vanilla_mlp_forward(x, weights, biases, lrelu_slope)
    out = jax.block_until_ready(out)
    assert out.shape == (N, out_node), out.shape

    ref = _reference_forward(x, weights, biases, lrelu_slope)
    max_err = jnp.max(jnp.abs(out - ref))
    assert jnp.allclose(out, ref, atol=2e-2, rtol=2e-2), max_err

    print("KERNEL_OK")
</pallas_src>

<mosaic_0001>
module attributes {stable_mosaic.version = 11 : i64} {
  func.func @_mlp_kernel(%arg0: i32, %arg1: memref<24x128xf32, #tpu.memory_space<vmem>>, %arg2: memref<32x24xf32, #tpu.memory_space<vmem>>, %arg3: memref<32x1xf32, #tpu.memory_space<vmem>>, %arg4: memref<32x32xf32, #tpu.memory_space<vmem>>, %arg5: memref<32x1xf32, #tpu.memory_space<vmem>>, %arg6: memref<32x32xf32, #tpu.memory_space<vmem>>, %arg7: memref<32x1xf32, #tpu.memory_space<vmem>>, %arg8: memref<4x32xf32, #tpu.memory_space<vmem>>, %arg9: memref<4x1xf32, #tpu.memory_space<vmem>>, %arg10: memref<4x128xf32, #tpu.memory_space<vmem>>) attributes {dimension_semantics = [#tpu.dimension_semantics<parallel>], iteration_bounds = array<i64: 1>, scalar_prefetch = 0 : i64, scratch_operands = 0 : i64, tpu.core_type = #tpu.core_type<tc>, window_params = [{transform_indices = @transform_0, window_bounds = array<i64: 24, 128>}, {pipeline_mode = #tpu.pipeline_mode<synchronous>, transform_indices = @transform_1, window_bounds = array<i64: 32, 24>}, {pipeline_mode = #tpu.pipeline_mode<synchronous>, transform_indices = @transform_2, window_bounds = array<i64: 32, 1>}, {pipeline_mode = #tpu.pipeline_mode<synchronous>, transform_indices = @transform_3, window_bounds = array<i64: 32, 32>}, {pipeline_mode = #tpu.pipeline_mode<synchronous>, transform_indices = @transform_4, window_bounds = array<i64: 32, 1>}, {pipeline_mode = #tpu.pipeline_mode<synchronous>, transform_indices = @transform_5, window_bounds = array<i64: 32, 32>}, {pipeline_mode = #tpu.pipeline_mode<synchronous>, transform_indices = @transform_6, window_bounds = array<i64: 32, 1>}, {pipeline_mode = #tpu.pipeline_mode<synchronous>, transform_indices = @transform_7, window_bounds = array<i64: 4, 32>}, {pipeline_mode = #tpu.pipeline_mode<synchronous>, transform_indices = @transform_8, window_bounds = array<i64: 4, 1>}, {transform_indices = @transform_9, window_bounds = array<i64: 4, 128>}]} {
    %c0 = arith.constant 0 : index
    %c0_0 = arith.constant 0 : index
    %0 = vector.load %arg1[%c0, %c0_0] : memref<24x128xf32, #tpu.memory_space<vmem>>, vector<24x128xf32>
    %c0_1 = arith.constant 0 : index
    %c0_2 = arith.constant 0 : index
    %1 = vector.load %arg2[%c0_1, %c0_2] : memref<32x24xf32, #tpu.memory_space<vmem>>, vector<32x24xf32>
    %c0_3 = arith.constant 0 : index
    %c0_4 = arith.constant 0 : index
    %2 = vector.load %arg3[%c0_3, %c0_4] : memref<32x1xf32, #tpu.memory_space<vmem>>, vector<32x1xf32>
    %cst = arith.constant dense<0.000000e+00> : vector<32x128xf32>
    %3 = tpu.matmul %1, %0, %cst {dimension_numbers = #tpu.dot_dimension_numbers<[1], [0], [0], [1], [0, 0, 1, 1], [], []>} : vector<32x24xf32>, vector<24x128xf32>, vector<32x128xf32> -> vector<32x128xf32>
    %4 = vector.broadcast %2 : vector<32x1xf32> to vector<32x128xf32>
    %5 = arith.addf %3, %4 : vector<32x128xf32>
    %cst_5 = arith.constant 0.000000e+00 : f32
    %6 = vector.broadcast %cst_5 : f32 to vector<32x128xf32>
    %7 = arith.cmpf oge, %5, %6 : vector<32x128xf32>
    %cst_6 = arith.constant 1.000000e-01 : f32
    %8 = vector.broadcast %cst_6 : f32 to vector<32x128xf32>
    %9 = arith.mulf %8, %5 : vector<32x128xf32>
    %10 = arith.select %7, %5, %9 : vector<32x128xi1>, vector<32x128xf32>
    %c0_7 = arith.constant 0 : index
    %c0_8 = arith.constant 0 : index
    %11 = vector.load %arg4[%c0_7, %c0_8] : memref<32x32xf32, #tpu.memory_space<vmem>>, vector<32x32xf32>
    %c0_9 = arith.constant 0 : index
    %c0_10 = arith.constant 0 : index
    %12 = vector.load %arg5[%c0_9, %c0_10] : memref<32x1xf32, #tpu.memory_space<vmem>>, vector<32x1xf32>
    %cst_11 = arith.constant dense<0.000000e+00> : vector<32x128xf32>
    %13 = tpu.matmul %11, %10, %cst_11 {dimension_numbers = #tpu.dot_dimension_numbers<[1], [0], [0], [1], [0, 0, 1, 1], [], []>} : vector<32x32xf32>, vector<32x128xf32>, vector<32x128xf32> -> vector<32x128xf32>
    %14 = vector.broadcast %12 : vector<32x1xf32> to vector<32x128xf32>
    %15 = arith.addf %13, %14 : vector<32x128xf32>
    %cst_12 = arith.constant 0.000000e+00 : f32
    %16 = vector.broadcast %cst_12 : f32 to vector<32x128xf32>
    %17 = arith.cmpf oge, %15, %16 : vector<32x128xf32>
    %cst_13 = arith.constant 1.000000e-01 : f32
    %18 = vector.broadcast %cst_13 : f32 to vector<32x128xf32>
    %19 = arith.mulf %18, %15 : vector<32x128xf32>
    %20 = arith.select %17, %15, %19 : vector<32x128xi1>, vector<32x128xf32>
    %c0_14 = arith.constant 0 : index
    %c0_15 = arith.constant 0 : index
    %21 = vector.load %arg6[%c0_14, %c0_15] : memref<32x32xf32, #tpu.memory_space<vmem>>, vector<32x32xf32>
    %c0_16 = arith.constant 0 : index
    %c0_17 = arith.constant 0 : index
    %22 = vector.load %arg7[%c0_16, %c0_17] : memref<32x1xf32, #tpu.memory_space<vmem>>, vector<32x1xf32>
    %cst_18 = arith.constant dense<0.000000e+00> : vector<32x128xf32>
    %23 = tpu.matmul %21, %20, %cst_18 {dimension_numbers = #tpu.dot_dimension_numbers<[1], [0], [0], [1], [0, 0, 1, 1], [], []>} : vector<32x32xf32>, vector<32x128xf32>, vector<32x128xf32> -> vector<32x128xf32>
    %24 = vector.broadcast %22 : vector<32x1xf32> to vector<32x128xf32>
    %25 = arith.addf %23, %24 : vector<32x128xf32>
    %cst_19 = arith.constant 0.000000e+00 : f32
    %26 = vector.broadcast %cst_19 : f32 to vector<32x128xf32>
    %27 = arith.cmpf oge, %25, %26 : vector<32x128xf32>
    %cst_20 = arith.constant 1.000000e-01 : f32
    %28 = vector.broadcast %cst_20 : f32 to vector<32x128xf32>
    %29 = arith.mulf %28, %25 : vector<32x128xf32>
    %30 = arith.select %27, %25, %29 : vector<32x128xi1>, vector<32x128xf32>
    %c0_21 = arith.constant 0 : index
    %c0_22 = arith.constant 0 : index
    %31 = vector.load %arg8[%c0_21, %c0_22] : memref<4x32xf32, #tpu.memory_space<vmem>>, vector<4x32xf32>
    %c0_23 = arith.constant 0 : index
    %c0_24 = arith.constant 0 : index
    %32 = vector.load %arg9[%c0_23, %c0_24] : memref<4x1xf32, #tpu.memory_space<vmem>>, vector<4x1xf32>
    %cst_25 = arith.constant dense<0.000000e+00> : vector<4x128xf32>
    %33 = tpu.matmul %31, %30, %cst_25 {dimension_numbers = #tpu.dot_dimension_numbers<[1], [0], [0], [1], [0, 0, 1, 1], [], []>} : vector<4x32xf32>, vector<32x128xf32>, vector<4x128xf32> -> vector<4x128xf32>
    %34 = vector.broadcast %32 : vector<4x1xf32> to vector<4x128xf32>
    %35 = arith.addf %33, %34 : vector<4x128xf32>
    %c0_26 = arith.constant 0 : index
    %c0_27 = arith.constant 0 : index
    %36 = vector.load %arg10[%c0_26, %c0_27] : memref<4x128xf32, #tpu.memory_space<vmem>>, vector<4x128xf32>
    tpu.vector_store %arg10[%c0_26, %c0_27], %35 {strides = array<i32>} : memref<4x128xf32, #tpu.memory_space<vmem>>, vector<4x128xf32>,
    return
  }
  func.func @transform_0(%arg0: i32) -> (i32, i32) {
    %c0_i32 = arith.constant 0 : i32
    %c0_i32_0 = arith.constant 0 : i32
    return %c0_i32, %arg0 : i32, i32
  }
  func.func @transform_1(%arg0: i32) -> (i32, i32) {
    %c0_i32 = arith.constant 0 : i32
    %c0_i32_0 = arith.constant 0 : i32
    %c0_i32_1 = arith.constant 0 : i32
    return %c0_i32, %c0_i32_0 : i32, i32
  }
  func.func @transform_2(%arg0: i32) -> (i32, i32) {
    %c0_i32 = arith.constant 0 : i32
    %c0_i32_0 = arith.constant 0 : i32
    %c0_i32_1 = arith.constant 0 : i32
    return %c0_i32, %c0_i32_0 : i32, i32
  }
  func.func @transform_3(%arg0: i32) -> (i32, i32) {
    %c0_i32 = arith.constant 0 : i32
    %c0_i32_0 = arith.constant 0 : i32
    %c0_i32_1 = arith.constant 0 : i32
    return %c0_i32, %c0_i32_0 : i32, i32
  }
  func.func @transform_4(%arg0: i32) -> (i32, i32) {
    %c0_i32 = arith.constant 0 : i32
    %c0_i32_0 = arith.constant 0 : i32
    %c0_i32_1 = arith.constant 0 : i32
    return %c0_i32, %c0_i32_0 : i32, i32
  }
  func.func @transform_5(%arg0: i32) -> (i32, i32) {
    %c0_i32 = arith.constant 0 : i32
    %c0_i32_0 = arith.constant 0 : i32
    %c0_i32_1 = arith.constant 0 : i32
    return %c0_i32, %c0_i32_0 : i32, i32
  }
  func.func @transform_6(%arg0: i32) -> (i32, i32) {
    %c0_i32 = arith.constant 0 : i32
    %c0_i32_0 = arith.constant 0 : i32
    %c0_i32_1 = arith.constant 0 : i32
    return %c0_i32, %c0_i32_0 : i32, i32
  }
  func.func @transform_7(%arg0: i32) -> (i32, i32) {
    %c0_i32 = arith.constant 0 : i32
    %c0_i32_0 = arith.constant 0 : i32
    %c0_i32_1 = arith.constant 0 : i32
    return %c0_i32, %c0_i32_0 : i32, i32
  }
  func.func @transform_8(%arg0: i32) -> (i32, i32) {
    %c0_i32 = arith.constant 0 : i32
    %c0_i32_0 = arith.constant 0 : i32
    %c0_i32_1 = arith.constant 0 : i32
    return %c0_i32, %c0_i32_0 : i32, i32
  }
  func.func @transform_9(%arg0: i32) -> (i32, i32) {
    %c0_i32 = arith.constant 0 : i32
    %c0_i32_0 = arith.constant 0 : i32
    return %c0_i32, %arg0 : i32, i32
  }
}

</mosaic_0001>

<bundles_post_ra>
// kernel: tpu_custom_call.1
= control target key start
LH: loop header
LB: loop body
LE: loop exit
PB: predicated region body
PF: predicated region fallthrough
CT: control target
= control target key end

     0   :  { %vm64_vm0 = vcmask 195584   ;;  %v664_v3 = vmov 0   ;;  %s821_s0 = inlined_call_operand.vmem [shape: f32[24,128], index: 0, kind: input, shape index: {}]   ;;  %s822_s1 = inlined_call_operand.vmem [shape: f32[32,24], index: 1, kind: input, shape index: {}]   ;;  %s823_s2 = inlined_call_operand.vmem [shape: f32[32,1], index: 2, kind: input, shape index: {}]   ;;  %s824_s3 = inlined_call_operand.vmem [shape: f32[32,32], index: 3, kind: input, shape index: {}]   ;;  %s825_s4 = inlined_call_operand.vmem [shape: f32[32,1], index: 4, kind: input, shape index: {}]   ;;  %s826_s5 = inlined_call_operand.vmem [shape: f32[32,32], index: 5, kind: input, shape index: {}]   ;;  %s827_s6 = inlined_call_operand.vmem [shape: f32[32,1], index: 6, kind: input, shape index: {}]   ;;  %s828_s7 = inlined_call_operand.vmem [shape: f32[4,32], index: 7, kind: input, shape index: {}]   ;;  %s829_s8 = inlined_call_operand.vmem [shape: f32[4,1], index: 8, kind: input, shape index: {}]   ;;  %s830_s9 = inlined_call_operand.hbm [shape: f32[4,128], index: 9, kind: output, shape index: {}]  }
   0x1   :  { %v35_v0 = vld [vmem:[%s821_s0 + $0x10] sm:$0xff]  ;;  %v34_v1 = vld [vmem:[%s821_s0 + $0x8] sm:$0xff]  ;;  %v36_v2 = vld [vmem:[%s822_s1] sm:$0xff]  ;;  %640 = vset.pattern.permute.xlu0 %v664_v3  ;;  %641 = vset.pattern.permute.xlu1 %v664_v3 }
   0x2   :  { %585 = vmatprep.subr.mxu0 %v35_v0  ;;  %v33_v4 = vld [vmem:[%s821_s0] sm:$0xff]  ;;  %591 = vmatprep.mubr.msk.f32.mxu0 %vm64_vm0, %v36_v2  ;;  %v43_v5 = vld [vmem:[%s823_s2 + $0x18] sm:$0xff]  ;;  %v41_v6 = vld [vmem:[%s823_s2 + $0x8] sm:$0xff] }
   0x3   :  { %586 = vmatpush3.msra.mxu0 %v35_v0  ;;  %61 = vperm.xlu0 %640, %v43_v5   ;;  %v37_v7 = vld [vmem:[%s822_s1 + $0x8] sm:$0xff]  ;;  %v42_v8 = vld [vmem:[%s823_s2 + $0x10] sm:$0xff]  ;;  %v40_v10 = vld [vmem:[%s823_s2] sm:$0xff] }
   0x4   :  { %587 = vmatprep.subr.mxu0 %v34_v1  ;;  %v38_v9 = vld [vmem:[%s822_s1 + $0x10] sm:$0xff]  ;;  %51 = vperm.xlu1 %641, %v41_v6  }
   0x5   :  { %588 = vmatpush3.msra.mxu0 %v34_v1 }
   0x6   :  { %589 = vmatprep.subr.mxu0 %v33_v4 }
   0x7   :  { %590 = vmatpush3.msra.mxu0 %v33_v4 }
   0x8   :  { %14 = vsyncpa [#allocation3], 0  ;;  %592 = vmatmul.mubr.msk.f32.vlgmr.msra.gmra.mxu0 %vm64_vm0, %v37_v7  ;;  %56 = vperm.xlu0 %640, %v42_v8   ;;  %v39_v11 = vld [vmem:[%s822_s1 + $0x18] sm:$0xff]  ;;  %v180_v13 = vld [vmem:[%s825_s4 + $0x10] sm:$0xff]  ;;  %vm202_vm1 = vcmask 261120   ;;  %v665_v5 = vmov 0.0  }
   0x9   :  { %594 = vmatprep.mubr.msk.f32.mxu0 %vm64_vm0, %v38_v9  ;;  %v181_v12 = vld [vmem:[%s825_s4 + $0x18] sm:$0xff]  ;;  %46 = vperm.xlu1 %641, %v40_v10   ;;  %v179_v14 = vld [vmem:[%s825_s4 + $0x8] sm:$0xff]  ;;  %v178_v15 = vld [vmem:[%s825_s4] sm:$0xff]  ;;  %vm666_vm10 = vmmov 0   ;;  %s667_s15 = smov [#allocation2]  }
   0xa   :  { %v319_v16 = vld [vmem:[%s827_s6 + $0x18] sm:$0xff]  ;;  %v318_v17 = vld [vmem:[%s827_s6 + $0x10] sm:$0xff]  ;;  %v317_v18 = vld [vmem:[%s827_s6 + $0x8] sm:$0xff]  ;;  %s536_s1 = sshll.u32 %s667_s15, 4  ;;  %s537_s1 = int_to_ptr.vmem [resolvable:$true] %s536_s1 }
   0xb   :  { %v316_v19 = vld [vmem:[%s827_s6] sm:$0xff]  ;;  %v175_v42 = vld [vmem:[%s824_s3 + $0x8] sm:$0xff]  ;;  %v176_v43 = vld [vmem:[%s824_s3 + $0x10] sm:$0xff]  ;;  %s642_s16 = scalar_lea.vmem %s537_s1, 64  ;;  %p647_p1 = scmp.lt.s32.totalorder %s537_s1, %s537_s1 }
   0xc   :  { %595 = vmatmul.mubr.msk.f32.gmra.mxu0 %vm64_vm0, %v39_v11  ;;  %199 = vperm.xlu0 %640, %v181_v12   ;;  %v450_v20 = vld [vmem:[%s829_s8] sm:$0xf]  ;;  %v177_v44 = vld [vmem:[%s824_s3 + $0x18] sm:$0xff]  ;;  %v313_v2 = vld [vmem:[%s826_s5 + $0x8] sm:$0xff]  ;;  %p643_p0 = scmp.ne.s32.totalorder %s537_s1, %s642_s16  ;;  %p648_p2 = scmp.lt.s32.totalorder %s642_s16, %s642_s16 }
   0xd   :  { %194 = vperm.xlu1 %641, %v180_v13   ;;  %v174_v21 = vld [vmem:[%s824_s3] sm:$0xff]  ;;  %v314_v3 = vld [vmem:[%s826_s5 + $0x10] sm:$0xff]  ;;  %v315_v4 = vld [vmem:[%s826_s5 + $0x18] sm:$0xff] }
   0xe   :  { %605 = vmatprep.mubr.msk.f32.mxu1 %vm202_vm1, %v174_v21  ;;  %v312_v45 = vld [vmem:[%s826_s5] sm:$0xff]  ;;  %p649_p3 = por %p648_p2, %p647_p1 }
   0xf   :  { %619 = vmatprep.mubr.msk.f32.mxu0 %vm202_vm1, %v312_v45 }
  0x10   :  { %189 = vperm.xlu0 %640, %v179_v14   ;;  %p650_p4 = pnand %p649_p3, %p643_p0 }
  0x11   :  { %184 = vperm.xlu1 %641, %v178_v15  }
  0x14   :  { %337 = vperm.xlu0 %640, %v319_v16  }
  0x15   :  { %332 = vperm.xlu1 %641, %v318_v17  }
  0x18   :  { %327 = vperm.xlu0 %640, %v317_v18  }
  0x19   :  { %322 = vperm.xlu1 %641, %v316_v19  }
  0x1c   :  { %453 = vperm.xlu0 %640, %v450_v20  }
  0x7e   :  { %v62_v22 = vpop.permute.xlu0 %61 }
  0x7f   :  { %v52_v23 = vpop.permute.xlu1 %51 }
  0x83   :  { %v57_v27 = vpop.permute.xlu0 %56 }
  0x84   :  { %v47_v30 = vpop.permute.xlu1 %46 }
  0x87   :  { %v200_v46 = vpop.permute.xlu0 %199 }
  0x88   :  { %v195_v47 = vpop.permute.xlu1 %194 }
  0x8b   :  { %v190_v50 = vpop.permute.xlu0 %189 }
  0x8c   :  { %v185_v54 = vpop.permute.xlu1 %184 }
  0x8f   :  { %v338_v6 = vpop.permute.xlu0 %337 }
  0x90   :  { %v333_v7 = vpop.permute.xlu1 %332 }
  0x93   :  { %v328_v10 = vpop.permute.xlu0 %327 }
  0x94   :  { %v323_v14 = vpop.permute.xlu1 %322 }
  0xc8   :  { %v593_v24 = vpop.f32.mrf.mxu0 }
  0xc9   :  { %v149_v28 = vadd.f32 %v593_v24, %v52_v23 }
  0xca   :  { %v143_v25 = vpop.f32.mrf.mxu0 }
  0xcb   :  { %v144_v32 = vadd.f32 %v143_v25, %v47_v30  ;;  %v167_v35 = vmul.f32 0.1, %v149_v28  ;;  %vm163_vm4 = vcmp.ge.f32.partialorder %v149_v28, 0.0  ;;  %v449_v25 = vld [vmem:[%s828_s7] sm:$0xf] }
  0xcc   :  { %v596_v26 = vpop.f32.mrf.mxu0 }
  0xcd   :  { %v159_v29 = vadd.f32 %v596_v26, %v62_v22  ;;  %v166_v38 = vmul.f32 0.1, %v144_v32  ;;  %vm162_vm5 = vcmp.ge.f32.partialorder %v144_v32, 0.0  ;;  %v171_v40 = vsel %vm163_vm4, %v149_v28, %v167_v35 }
  0xce   :  { %v153_v31 = vpop.f32.mrf.mxu0 }
  0xcf   :  { %v154_v33 = vadd.f32 %v153_v31, %v57_v27  ;;  %vm165_vm2 = vcmp.ge.f32.partialorder %v159_v29, 0.0  ;;  %v169_v34 = vmul.f32 0.1, %v159_v29  ;;  %v170_v41 = vsel %vm162_vm5, %v144_v32, %v166_v38  ;;  %v454_v27 = vpop.permute.xlu0 %453 }
  0xd1   :  { %v168_v36 = vmul.f32 0.1, %v154_v33  ;;  %v173_v37 = vsel %vm165_vm2, %v159_v29, %v169_v34  ;;  %vm164_vm3 = vcmp.ge.f32.partialorder %v154_v33, 0.0 }
  0xd2   :  { %597 = vmatprep.subr.mxu1 %v173_v37 }
  0xd3   :  { %598 = vmatpush3.msra.mxu1 %v173_v37  ;;  %v172_v39 = vsel %vm164_vm3, %v154_v33, %v168_v36 }
  0xd4   :  { %599 = vmatprep.subr.mxu1 %v172_v39 }
  0xd5   :  { %600 = vmatpush3.msra.mxu1 %v172_v39 }
  0xd6   :  { %601 = vmatprep.subr.mxu1 %v171_v40 }
  0xd7   :  { %602 = vmatpush3.msra.mxu1 %v171_v40 }
  0xd8   :  { %603 = vmatprep.subr.mxu1 %v170_v41 }
  0xd9   :  { %604 = vmatpush3.msra.mxu1 %v170_v41 }
  0xda   :  { %606 = vmatmul.mubr.msk.f32.vlgmr.msra.gmra.mxu1 %vm202_vm1, %v175_v42  ;;  %625 = vmatprep.subr.mxu1 %v665_v5 }
  0xdb   :  { %608 = vmatprep.mubr.msk.f32.mxu1 %vm202_vm1, %v176_v43 }
  0xde   :  { %609 = vmatmul.mubr.msk.f32.gmra.mxu1 %vm202_vm1, %v177_v44 }
  0xdf   :  { %633 = vmatprep.mubr.msk.f32.mxu1 %vm666_vm10, %v665_v5 }
 0x19a   :  { %v607_v48 = vpop.f32.mrf.mxu1 }
 0x19b   :  { %v287_v52 = vadd.f32 %v607_v48, %v190_v50 }
 0x19c   :  { %v281_v49 = vpop.f32.mrf.mxu1 }
 0x19d   :  { %v282_v56 = vadd.f32 %v281_v49, %v185_v54  ;;  %v305_v59 = vmul.f32 0.1, %v287_v52  ;;  %vm301_vm8 = vcmp.ge.f32.partialorder %v287_v52, 0.0 }
 0x19e   :  { %v610_v51 = vpop.f32.mrf.mxu1 }
 0x19f   :  { %v297_v53 = vadd.f32 %v610_v51, %v200_v46  ;;  %v304_v62 = vmul.f32 0.1, %v282_v56  ;;  %vm300_vm9 = vcmp.ge.f32.partialorder %v282_v56, 0.0  ;;  %v309_v0 = vsel %vm301_vm8, %v287_v52, %v305_v59 }
 0x1a0   :  { %v291_v55 = vpop.f32.mrf.mxu1 }
 0x1a1   :  { %v307_v57 = vmul.f32 0.1, %v297_v53  ;;  %v292_v58 = vadd.f32 %v291_v55, %v195_v47  ;;  %vm303_vm6 = vcmp.ge.f32.partialorder %v297_v53, 0.0  ;;  %v308_v1 = vsel %vm300_vm9, %v282_v56, %v304_v62 }
 0x1a3   :  { %v306_v60 = vmul.f32 0.1, %v292_v58  ;;  %v311_v61 = vsel %vm303_vm6, %v297_v53, %v307_v57  ;;  %vm302_vm7 = vcmp.ge.f32.partialorder %v292_v58, 0.0 }
 0x1a4   :  { %611 = vmatprep.subr.mxu0 %v311_v61 }
 0x1a5   :  { %612 = vmatpush3.msra.mxu0 %v311_v61  ;;  %v310_v63 = vsel %vm302_vm7, %v292_v58, %v306_v60 }
 0x1a6   :  { %613 = vmatprep.subr.mxu0 %v310_v63 }
 0x1a7   :  { %614 = vmatpush3.msra.mxu0 %v310_v63 }
 0x1a8   :  { %615 = vmatprep.subr.mxu0 %v309_v0 }
 0x1a9   :  { %616 = vmatpush3.msra.mxu0 %v309_v0 }
 0x1aa   :  { %617 = vmatprep.subr.mxu0 %v308_v1 }
 0x1ab   :  { %618 = vmatpush3.msra.mxu0 %v308_v1 }
 0x1ac   :  { %620 = vmatmul.mubr.msk.f32.vlgmr.msra.gmra.mxu0 %vm202_vm1, %v313_v2 }
 0x1ad   :  { %622 = vmatprep.mubr.msk.f32.mxu0 %vm202_vm1, %v314_v3 }
 0x1b0   :  { %623 = vmatmul.mubr.msk.f32.gmra.mxu0 %vm202_vm1, %v315_v4 }
 0x26c   :  { %v621_v8 = vpop.f32.mrf.mxu0 }
 0x26d   :  { %v424_v12 = vadd.f32 %v621_v8, %v328_v10 }
 0x26e   :  { %v418_v9 = vpop.f32.mrf.mxu0 }
 0x26f   :  { %v419_v16 = vadd.f32 %v418_v9, %v323_v14  ;;  %v442_v19 = vmul.f32 0.1, %v424_v12  ;;  %vm438_vm13 = vcmp.ge.f32.partialorder %v424_v12, 0.0 }
 0x270   :  { %v624_v11 = vpop.f32.mrf.mxu0 }
 0x271   :  { %v434_v13 = vadd.f32 %v624_v11, %v338_v6  ;;  %v441_v22 = vmul.f32 0.1, %v419_v16  ;;  %vm437_vm14 = vcmp.ge.f32.partialorder %v419_v16, 0.0  ;;  %v446_v24 = vsel %vm438_vm13, %v424_v12, %v442_v19 }
 0x272   :  { %v428_v15 = vpop.f32.mrf.mxu0 }
 0x273   :  { %vm440_vm11 = vcmp.ge.f32.partialorder %v434_v13, 0.0  ;;  %v444_v17 = vmul.f32 0.1, %v434_v13  ;;  %v429_v18 = vadd.f32 %v428_v15, %v333_v7  ;;  %v445_v26 = vsel %vm437_vm14, %v419_v16, %v441_v22 }
 0x275   :  { %vm439_vm12 = vcmp.ge.f32.partialorder %v429_v18, 0.0  ;;  %v443_v20 = vmul.f32 0.1, %v429_v18  ;;  %v448_v21 = vsel %vm440_vm11, %v434_v13, %v444_v17 }
 0x276   :  { %626 = vmatpush3.msra.mxu1 %v448_v21 }
 0x277   :  { %627 = vmatprep.subr.mxu1 %v665_v5  ;;  %v447_v23 = vsel %vm439_vm12, %v429_v18, %v443_v20 }
 0x278   :  { %628 = vmatpush3.msra.mxu1 %v447_v23 }
 0x279   :  { %629 = vmatprep.subr.mxu1 %v665_v5 }
 0x27a   :  { %630 = vmatpush3.msra.mxu1 %v446_v24 }
 0x27b   :  { %631 = vmatprep.subr.mxu1 %v665_v5 }
 0x27c   :  { %632 = vmatpush3.msra.mxu1 %v445_v26 }
 0x27d   :  { %634 = vmatmul.mubr.msk.f32.vlgmr.msra.gmra.mxu1 %vm202_vm1, %v449_v25 }
 0x33d   :  { %v525_v28 = vpop.f32.mrf.mxu1 }
 0x33e   :  { %v526_v29 = vadd.f32 %v525_v28, %v454_v27 }
 0x33f   :  { %v635_v30 = vpop.f32.mrf.mxu1 }
 0x340   :  { %529 = vst [vmem:[#allocation2] sm:$0xf] %v526_v29 }
 0x341   :  { %653 = shalt.err (!%p650_p4)
}
 0x342   :  { %539 = dma.vmem_to_hbm [thread:$0]  %s537_s1, 64, %s830_s9, [#allocation3]  }
 0x343   :  { %662 = dma.done.wait [#allocation3], 64  }
 0x344   :  { %663 = vsyncadd [#allocation3], 4294967232 }
 0x345   :  { %543 = vsyncpa [#allocation3], 1 }

</bundles_post_ra>
